<compile_context>
chip_gen: v6e
topology: v6e:2x2x1
jax: 0.10.0
libtpu: 0.0.40
codegen_flags: <defaults>
</compile_context>

<pallas_src>
import functools

import jax
import jax.numpy as jnp
from jax import lax
from jax.experimental import pallas as pl
from jax.experimental.pallas import tpu as pltpu

_LANES = 128
_SUBLANES = 8
_MAX_BLOCK_BYTES = 4 * 1024 * 1024      # per-input VMEM block; x2 inputs x2 buffers = 16 MiB
_VMEM_LIMIT_BYTES = 32 * 1024 * 1024    # headroom; fits v5e/v6e (128 MiB) and v7x (64 MiB) physical


def _round_up(n, m):
    return ((n + m - 1) // m) * m


def _focal_weight(one_minus_pt, gamma):
    """(1 - pt)**gamma; small integer gammas via repeated multiply (pure VPU)."""
    g = float(gamma)
    if g == 0.0:
        return jnp.ones_like(one_minus_pt)
    if g == int(g) and 1.0 <= g <= 8.0:
        out = one_minus_pt
        for _ in range(int(g) - 1):
            out = out * one_minus_pt
        return out
    return one_minus_pt ** g            # generic pow path (EUP), non-integer gamma only


def _focal_elements(x, t, alpha, gamma, binary_targets):
    """Elementwise focal loss in f32 (numerically-stable BCE-with-logits). Kernel-side."""
    x = x.astype(jnp.float32)
    t = t.astype(jnp.float32)
    e = jnp.exp(-jnp.abs(x))                          # EUP #1
    bce = jnp.maximum(x, 0.0) - x * t + jnp.log1p(e)  # EUP #2
    if binary_targets:
        # For t in {0,1}: exp(x*t - max(x,0)) is either 1.0 or e (VPU select);
        # denominator via the cheap EUP approximate reciprocal. Saves one
        # transcendental/elem -- matters on v7x/bf16 where EUP, not HBM, binds.
        mismatch = jnp.logical_xor(x >= 0.0, t >= 0.5)
        pt = jnp.where(mismatch, e, 1.0) * pl.reciprocal(1.0 + e, approx=True)
    else:
        pt = jnp.exp(-bce)                            # EUP #3 (exact; soft targets OK)
    focal = _focal_weight(1.0 - pt, gamma) * bce
    if float(alpha) != 1.0:
        focal = float(alpha) * focal
    return focal


def _focal_tail(x, t, alpha, gamma):
    """Plain-JAX exact focal loss for the <128-element remainder."""
    x = x.astype(jnp.float32)
    t = t.astype(jnp.float32)
    bce = jnp.maximum(x, 0.0) - x * t + jnp.log1p(jnp.exp(-jnp.abs(x)))
    pt = jnp.exp(-bce)
    return float(alpha) * _focal_weight(1.0 - pt, gamma) * bce


def _focal_partial_kernel(x_ref, t_ref, psum_ref, *, alpha, gamma, binary_targets,
                          block_rows, total_rows, ragged):
    """One grid step: focal loss on a (block_rows, 128) tile reduced to an (8, 128)
    partial sum written to this step's own output block (no carried state)."""
    focal = _focal_elements(x_ref[...], t_ref[...], alpha, gamma, binary_targets)

    def _reduce_write(f):
        # Sublane-group adds only (VPU); the (8,128) store is a full unmasked vreg store.
        psum_ref[0] = jnp.sum(f.reshape(-1, _SUBLANES, _LANES), axis=0)

    if not ragged:
        _reduce_write(focal)
    else:
        i = pl.program_id(0)
        last = pl.num_programs(0) - 1

        @pl.when(i != last)
        def _():
            _reduce_write(focal)

        @pl.when(i == last)
        def _():
            # Only the single ragged last block pays for the row mask. Rows past the
            # end of the input hold unspecified VMEM data; select (not multiply)
            # zeroes them exactly, including NaN/inf garbage.
            rows_in_block = lax.broadcasted_iota(jnp.int32, focal.shape, 0)
            valid = (i * block_rows + rows_in_block) < total_rows
            _reduce_write(jnp.where(valid, focal, 0.0))


def focal_loss(inputs, targets, alpha=1.0, gamma=2.0, reduction="mean",
               binary_targets=False):
    """Focal loss with logits. Elementwise math + per-block reduction run in Pallas;
    the tiny cross-block sum / mean runs in plain JAX.

    binary_targets=True enables an exact-for-{0,1}-targets fast path with one fewer
    transcendental per element (uses an approximate reciprocal); do not use it with
    soft targets.
    """
    assert inputs.shape == targets.shape
    n_valid = int(inputs.size)

    if reduction not in ("mean", "sum"):
        # TODO(synk): reduction='none' needs an elementwise output spec; only the
        # 'mean'/'sum' reductions are emitted from this kernel path.
        raise NotImplementedError("reduction='none' not supported in this kernel")

    if n_valid == 0:
        return jnp.float32(jnp.nan) if reduction == "mean" else jnp.float32(0.0)

    x = jnp.ravel(inputs)          # keep native dtype; cast to f32 inside the kernel
    t = jnp.ravel(targets)

    rows = n_valid // _LANES
    n_main = rows * _LANES
    rem = n_valid - n_main

    total = jnp.float32(0.0)

    # <128-element remainder: plain JAX (tiny); avoids any padding copy of the bulk.
    if rem:
        total = total + jnp.sum(_focal_tail(x[n_main:], t[n_main:], alpha, gamma))

    if rows:
        x_itm = jnp.dtype(x.dtype).itemsize
        t_itm = jnp.dtype(t.dtype).itemsize
        # Sublane tile of the narrowest dtype: 8 rows for 4B, 16 for 2B, 32 for 1B.
        sub = _SUBLANES * max(1, 4 // max(1, min(x_itm, t_itm)))
        # ~4 MiB per input block for the wider dtype, rounded to the sublane tile.
        max_rows = max(sub, (_MAX_BLOCK_BYTES // (_LANES * max(x_itm, t_itm))) // sub * sub)
        # Aim for >= 2 grid steps so the "parallel" axis shards across v7x's 2 TCs.
        target_rows = _round_up((rows + 1) // 2, sub)
        block_rows = max(sub, min(max_rows, target_rows))
        num_blocks = -(-rows // block_rows)
        ragged = (rows % block_rows) != 0

        # When numel % 128 == 0 the prefix slice is the identity and the reshape is a
        # free bitcast -> no extra HBM traffic (old jnp.pad path copied both inputs).
        x2 = x[:n_main].reshape(rows, _LANES)
        t2 = t[:n_main].reshape(rows, _LANES)

        kernel = functools.partial(
            _focal_partial_kernel,
            alpha=float(alpha), gamma=float(gamma),
            binary_targets=bool(binary_targets),
            block_rows=block_rows, total_rows=rows, ragged=ragged)

        cost = pl.CostEstimate(
            flops=12 * n_main,
            transcendentals=(2 if binary_targets else 3) * n_main,
            bytes_accessed=n_main * (x_itm + t_itm)
            + num_blocks * _SUBLANES * _LANES * 4)

        partials = pl.pallas_call(
            kernel,
            out_shape=jax.ShapeDtypeStruct((num_blocks, _SUBLANES, _LANES), jnp.float32),
            grid_spec=pltpu.PrefetchScalarGridSpec(
                num_scalar_prefetch=0,
                grid=(num_blocks,),
                in_specs=[
                    pl.BlockSpec((block_rows, _LANES), lambda i: (i, 0)),
                    pl.BlockSpec((block_rows, _LANES), lambda i: (i, 0)),
                ],
                out_specs=pl.BlockSpec((1, _SUBLANES, _LANES), lambda i: (i, 0, 0)),
            ),
            compiler_params=pltpu.CompilerParams(
                # Independent per-block partials -> megacore-splittable.
                dimension_semantics=("parallel",),
                vmem_limit_bytes=_VMEM_LIMIT_BYTES,
            ),
            cost_estimate=cost,
        )(x2, t2)

        total = total + jnp.sum(partials)     # tiny (num_blocks*8*128) reduce in JAX

    if reduction == "sum":
        return total
    return total / jnp.float32(n_valid)


def _focal_loss_ref(inputs, targets, alpha=1.0, gamma=2.0):
    x = inputs.astype(jnp.float32)
    t = targets.astype(jnp.float32)
    bce = jnp.maximum(x, 0.0) - x * t + jnp.log1p(jnp.exp(-jnp.abs(x)))
    pt = jnp.exp(-bce)
    return jnp.mean(alpha * (1.0 - pt) ** gamma * bce)


if __name__ == "__main__":
    key = jax.random.PRNGKey(0)
    k1, k2 = jax.random.split(key)
    # Small NCHW-like shape for logits and binary targets.
    shape = (2, 4, 16, 16)
    logits = jax.random.normal(k1, shape, dtype=jnp.float32) * 2.0
    targets = (jax.random.uniform(k2, shape) > 0.5).astype(jnp.float32)

    ref_mean = _focal_loss_ref(logits, targets)

    # Exact path (handles soft targets), mean reduction.
    out_mean = jax.block_until_ready(focal_loss(logits, targets))
    assert jnp.allclose(out_mean, ref_mean, rtol=1e-5, atol=1e-6), (out_mean, ref_mean)

    # Exact path, sum reduction.
    out_sum = jax.block_until_ready(focal_loss(logits, targets, reduction="sum"))
    assert jnp.allclose(out_sum, ref_mean * logits.size, rtol=1e-5, atol=1e-4), (
        out_sum, ref_mean * logits.size)

    # Binary-target fast path (one fewer transcendental; approximate reciprocal).
    out_fast = jax.block_until_ready(focal_loss(logits, targets, binary_targets=True))
    assert jnp.allclose(out_fast, ref_mean, rtol=2e-3, atol=2e-3), (out_fast, ref_mean)

    # Odd size: exercises the plain-JAX remainder (<128 elems) and the ragged,
    # masked last grid block (no padding copies anywhere).
    n_odd = 128 * 21 + 5
    lo = jax.random.normal(k1, (n_odd,), dtype=jnp.float32) * 2.0
    to = (jax.random.uniform(k2, (n_odd,)) > 0.5).astype(jnp.float32)
    out_odd = jax.block_until_ready(focal_loss(lo, to))
    ref_odd = _focal_loss_ref(lo, to)
    assert jnp.allclose(out_odd, ref_odd, rtol=1e-5, atol=1e-6), (out_odd, ref_odd)

    print("KERNEL_OK")
</pallas_src>

<mosaic_0001>
module attributes {stable_mosaic.version = 11 : i64} {
  func.func @_focal_partial_kernel(%arg0: i32, %arg1: memref<8x128xf32, #tpu.memory_space<vmem>>, %arg2: memref<8x128xf32, #tpu.memory_space<vmem>>, %arg3: memref<1x8x128xf32, #tpu.memory_space<vmem>>) attributes {dimension_semantics = [#tpu.dimension_semantics<parallel>], iteration_bounds = array<i64: 2>, scalar_prefetch = 0 : i64, scratch_operands = 0 : i64, tpu.core_type = #tpu.core_type<tc>, window_params = [{transform_indices = @transform_0, window_bounds = array<i64: 8, 128>}, {transform_indices = @transform_1, window_bounds = array<i64: 8, 128>}, {transform_indices = @transform_2, window_bounds = array<i64: 1, 8, 128>}]} {
    %c0 = arith.constant 0 : index
    %c0_0 = arith.constant 0 : index
    %0 = vector.load %arg1[%c0, %c0_0] : memref<8x128xf32, #tpu.memory_space<vmem>>, vector<8x128xf32>
    %c0_1 = arith.constant 0 : index
    %c0_2 = arith.constant 0 : index
    %1 = vector.load %arg2[%c0_1, %c0_2] : memref<8x128xf32, #tpu.memory_space<vmem>>, vector<8x128xf32>
    %2 = math.absf %0 : vector<8x128xf32>
    %cst = arith.constant 0.000000e+00 : f32
    %3 = vector.broadcast %cst : f32 to vector<8x128xf32>
    %4 = arith.subf %3, %2 : vector<8x128xf32>
    %5 = math.exp %4 : vector<8x128xf32>
    %cst_3 = arith.constant 0.000000e+00 : f32
    %6 = vector.broadcast %cst_3 : f32 to vector<8x128xf32>
    %7 = arith.maximumf %0, %6 : vector<8x128xf32>
    %8 = arith.mulf %0, %1 : vector<8x128xf32>
    %9 = arith.subf %7, %8 : vector<8x128xf32>
    %10 = math.log1p %5 : vector<8x128xf32>
    %11 = arith.addf %9, %10 : vector<8x128xf32>
    %cst_4 = arith.constant 0.000000e+00 : f32
    %12 = vector.broadcast %cst_4 : f32 to vector<8x128xf32>
    %13 = arith.subf %12, %11 : vector<8x128xf32>
    %14 = math.exp %13 : vector<8x128xf32>
    %cst_5 = arith.constant 1.000000e+00 : f32
    %15 = vector.broadcast %cst_5 : f32 to vector<8x128xf32>
    %16 = arith.subf %15, %14 : vector<8x128xf32>
    %17 = arith.mulf %16, %16 : vector<8x128xf32>
    %18 = arith.mulf %17, %11 : vector<8x128xf32>
    %19 = vector.shape_cast %18 : vector<8x128xf32> to vector<1x8x128xf32>
    %cst_6 = arith.constant dense<0.000000e+00> : vector<8x128xf32>
    %20 = vector.multi_reduction <add>, %19, %cst_6 [0] : vector<1x8x128xf32> to vector<8x128xf32>
    %c0_7 = arith.constant 0 : index
    %c0_8 = arith.constant 0 : index
    %c0_9 = arith.constant 0 : index
    %21 = vector.load %arg3[%c0_7, %c0_8, %c0_9] : memref<1x8x128xf32, #tpu.memory_space<vmem>>, vector<1x8x128xf32>
    %22 = vector.shape_cast %21 : vector<1x8x128xf32> to vector<8x128xf32>
    %23 = vector.shape_cast %20 : vector<8x128xf32> to vector<1x8x128xf32>
    tpu.vector_store %arg3[%c0_7, %c0_8, %c0_9], %23 {strides = array<i32>} : memref<1x8x128xf32, #tpu.memory_space<vmem>>, vector<1x8x128xf32>,
    return
  }
  func.func @transform_0(%arg0: i32) -> (i32, i32) {
    %c0_i32 = arith.constant 0 : i32
    %c0_i32_0 = arith.constant 0 : i32
    return %arg0, %c0_i32 : i32, i32
  }
  func.func @transform_1(%arg0: i32) -> (i32, i32) {
    %c0_i32 = arith.constant 0 : i32
    %c0_i32_0 = arith.constant 0 : i32
    return %arg0, %c0_i32 : i32, i32
  }
  func.func @transform_2(%arg0: i32) -> (i32, i32, i32) {
    %c0_i32 = arith.constant 0 : i32
    %c0_i32_0 = arith.constant 0 : i32
    %c0_i32_1 = arith.constant 0 : i32
    return %arg0, %c0_i32, %c0_i32_0 : i32, i32, i32
  }
}

</mosaic_0001>

<bundles_post_ra>
// kernel: tpu_custom_call.1
= control target key start
LH: loop header
LB: loop body
LE: loop exit
PB: predicated region body
PF: predicated region fallthrough
CT: control target
= control target key end

     0   :  { %7 = vsyncpa [#allocation3], 0  ;;  %s745_s0 = inlined_call_operand.hbm [shape: f32[16,128], index: 0, kind: input, shape index: {}]   ;;  %s746_s1 = inlined_call_operand.hbm [shape: f32[16,128], index: 1, kind: input, shape index: {}]   ;;  %s747_s2 = inlined_call_operand.hbm [shape: f32[2,8,128], index: 2, kind: output, shape index: {}]  }
   0x1   :  { %9 = vsyncpa [#allocation3 + $0x1], 0 }
   0x2   :  { %10 = vsyncpa [#allocation6], 0 }
   0x3   :  { %12 = vsyncpa [#allocation6 + $0x1], 0 }
   0x4   :  { %13 = vsyncpa [#allocation4], 0 }
   0x5   :  { %15 = vsyncpa [#allocation4 + $0x1], 0  ;;  %s546_s9 = smov 0   ;;  %s548_s10 = smov 0  }
   0x6   :  { %s550_s11 = smov 0   ;;  %s552_s12 = smov 0  }
   0x7 LB: > { %s567_s13 = sadd.s32 4294967295, %s526_s12   ;;  %s330_s14 = sadd.s32 4294967294, %s526_s12   ;;  %s526_s12 = sphi %s552_s12, %s766_s12   ;;  %s522_s11 = sphi %s550_s11, %s765_s11   ;;  %s518_s10 = sphi %s548_s10, %s764_s10   ;;  %s514_s9 = sphi %s546_s9, %s763_s9  }
   0x8   : > { %s571_s15 = sadd.s32 1, %s526_s12   ;;  %s28_s16 = sadd.s32 1, %s522_s11 }
   0x9   : > { %s25_s17 = ssub.s32 %s526_s12, %s571_s15  ;;  %p35_p0 = scmp.ne.s32.totalorder %s522_s11, %s518_s10 }
   0xa   : > { %p26_p1 = scmp.eq.s32.totalorder %s25_s17, 0  ;;  %p36_p2 = scmp.eq.s32.totalorder %s526_s12, 0 }
   0xb   : > { %p41_p3 = scmp.ne.s32.totalorder %s518_s10, %s514_s9  ;;  %p42_p4 = scmp.eq.s32.totalorder %s567_s13, 0 }
   0xc   : > { %s583_s18 = scalar_select %p26_p1, %s522_s11, %s28_s16  }
   0xd   : > { %p585_p5 = por %p36_p2, %p35_p0  ;;  %p589_p6 = por %p42_p4, %p41_p3 }
   0xe   : > { %p91_p7 = scmp.eq.s32.totalorder %s567_s13, 1  ;;  %p97_p8 = scmp.eq.s32.totalorder %s330_s14, 1 }
   0xf   : > { %s751_s20 = scalar_select %p589_p6, 1, 0 }
  0x10   : > { %p362_p10 = scmp.lt.s32.totalorder %s526_s12, 2  ;;  %p596_p11 = por %p91_p7, %p35_p0 }
  0x11   : > { %p600_p12 = por %p97_p8, %p41_p3  ;;  %s605_s23 = sand.u32 1, %s522_s11  }
  0x12   : > { %s752_s21 = scalar_select %p596_p11, 1, 0 }
  0x13   : > { %s753_s22 = scalar_select %p600_p12, 1, 0 }
  0x14   : > { %s334_s24 = sshll.u32 %s526_s12, 7  ;;  %s333_s25 = sshll.u32 %s605_s23, 3 }
  0x15   : > { %s614_s28 = scalar_lea.hbm %s745_s0, %s334_s24  ;;  %s121_s29 = scalar_lea.vmem [#allocation2], %s333_s25 }
  0x16   : > { %s128_s30 = sshll.u32 %s121_s29, 4  ;;  %p620_p13 = pnand %p362_p10, %p585_p5  ;;  %s624_s30 = int_to_ptr.vmem [resolvable:$true] %s128_s30 }
  0x17   : > { %s118_s4 = scalar_lea.sflag [#allocation3], %s605_s23  ;;  %s402_s5 = scalar_lea.hbm %s614_s28, 128 }
  0x18   : > { %p403_p2 = scmp.ne.s32.totalorder %s614_s28, %s402_s5  ;;  %p404_p3 = pneg %p620_p13 }
  0x19   : > { %s407_s8 = scalar_lea.hbm %s745_s0, 256  ;;  %p408_p5 = scmp.lt.s32.totalorder %s614_s28, %s745_s0 }
  0x1a   : > { %p405_p4 = pnand %p404_p3, %p403_p2  ;;  %p409_p8 = scmp.lt.s32.totalorder %s407_s8, %s402_s5 }
  0x1c   : > { %p406_p7 = pneg %p405_p4  ;;  %p410_p10 = por %p409_p8, %p408_p5 }
  0x1e   : > { %p411_p9 = pnand %p410_p10, %p406_p7 }
  0x20   : > { %414 = shalt.err (!%p411_p9)
}
  0x21   : > { %s415_s17 = scalar_lea.vmem %s624_s30, 128  ;;  %s528_s19 = smov [#allocation2]  }
  0x22   : > { %p416_p0 = scmp.ne.s32.totalorder %s624_s30, %s415_s17  ;;  %s420_s26 = sshll.u32 %s528_s19, 4  ;;  %s421_s26 = int_to_ptr.vmem [resolvable:$false] %s420_s26 }
  0x23   : > { %s422_s27 = scalar_lea.vmem %s421_s26, 256  ;;  %p423_p1 = scmp.lt.s32.totalorder %s624_s30, %s421_s26 }
  0x24   : > { %p418_p2 = pnand %p416_p0, %p404_p3  ;;  %p424_p12 = scmp.lt.s32.totalorder %s422_s27, %s415_s17 }
  0x26   : > { %p419_p4 = pneg %p418_p2  ;;  %p425_p11 = por %p424_p12, %p423_p1 }
  0x28   : > { %p426_p5 = pnand %p425_p11, %p419_p4 }
  0x2a   : > { %429 = shalt.err (!%p426_p5)
}
  0x2b   : > { %354 = dma.hbm_to_vmem [thread:$0]  (!%p620_p13), %s614_s28, 128, %s624_s30, %s118_s4  }
  0x2c   : > { %p755_p9 = scmp.lt.s32.totalorder %s526_s12, 3  ;;  %p756_p0 = scmp.ge.s32.totalorder %s526_s12, 1 }
  0x2d   : > { %s666_s7 = scalar_lea.hbm %s746_s1, %s334_s24  ;;  %s139_s8 = scalar_lea.vmem [#allocation5], %s333_s25 }
  0x2e   : > { %p657_p7 = pnand %p756_p0, %p755_p9  ;;  %s146_s14 = sshll.u32 %s139_s8, 4  ;;  %s147_s14 = int_to_ptr.vmem [resolvable:$true] %s146_s14 }
  0x2f   : > { %s136_s28 = scalar_lea.sflag [#allocation6], %s605_s23  ;;  %s430_s30 = scalar_lea.hbm %s666_s7, 128 }
  0x30   : > { %s757_s29 = scalar_select %p657_p7, 1, 0 }
  0x31   : > { %p431_p11 = scmp.ne.s32.totalorder %s666_s7, %s430_s30  ;;  %s435_s17 = scalar_lea.hbm %s746_s1, 256 }
  0x32   : > { %p436_p8 = scmp.lt.s32.totalorder %s666_s7, %s746_s1  ;;  %p437_p10 = scmp.lt.s32.totalorder %s435_s17, %s430_s30 }
  0x33   : > { %p433_p12 = pnand %p431_p11, %p404_p3 }
  0x34   : > { %p438_p2 = por %p437_p10, %p436_p8 }
  0x35   : > { %p434_p1 = pneg %p433_p12 }
  0x37   : > { %p439_p4 = pnand %p438_p2, %p434_p1 }
  0x39   : > { %442 = shalt.err (!%p439_p4)
}
  0x3a   : > { %s443_s25 = scalar_lea.vmem %s147_s14, 128  ;;  %s529_s23 = smov [#allocation5]  }
  0x3b   : > { %p444_p5 = scmp.ne.s32.totalorder %s147_s14, %s443_s25  ;;  %s448_s26 = sshll.u32 %s529_s23, 4  ;;  %s449_s26 = int_to_ptr.vmem [resolvable:$false] %s448_s26 }
  0x3c   : > { %s450_s27 = scalar_lea.vmem %s449_s26, 256  ;;  %p451_p11 = scmp.lt.s32.totalorder %s147_s14, %s449_s26 }
  0x3d   : > { %p446_p9 = pnand %p444_p5, %p404_p3  ;;  %p452_p12 = scmp.lt.s32.totalorder %s450_s27, %s443_s25 }
  0x3f   : > { %p447_p0 = pneg %p446_p9  ;;  %p453_p6 = por %p452_p12, %p451_p11 }
  0x41   : > { %p454_p7 = pnand %p453_p6, %p447_p0 }
  0x43   : > { %457 = shalt.err (!%p454_p7)
}
  0x44   : > { %357 = dma.hbm_to_vmem [thread:$0]  (!%p620_p13), %s666_s7, 128, %s147_s14, %s136_s28  }
  0x45   : > { %p758_p1 = scmp.ne.s32.totalorder %s757_s29, 0 }
  0x46   : > { %s692_s5 = sand.u32 (!%p758_p1), 1, %s518_s10   ;;  %p759_p6 = scmp.ne.s32.totalorder (!%p758_p1), %s751_s20, 0 }
  0x47   : > { %155 = sbr.rel (%p758_p1) target bundleno = 158 (0x9e), region = 28  ;;  %s695_s6 = sshll.u32 (!%p758_p1), %s692_s5, 3 }
  0x48   : > { %s158_s8 = scalar_lea.sflag (!%p758_p1), [#allocation3], %s692_s5  ;;  %s161_s30 = scalar_lea.vmem (!%p758_p1), [#allocation2], %s695_s6 }
  0x4c   : > { %501 = dma.done.wait (%p759_p6), %s158_s8, 128  }
  0x4d   : > { %503 = vsyncadd (%p759_p6), %s158_s8, 4294967168  ;;  %s167_s3 = scalar_lea.sflag [#allocation6], %s692_s5  ;;  %s170_s29 = scalar_lea.vmem [#allocation5], %s695_s6 }
  0x4e   : > { %505 = dma.done.wait (%p759_p6), %s167_s3, 128  }
  0x4f   : > { %507 = vsyncadd (%p759_p6), %s167_s3, 4294967168  ;;  %v196_v0 = vld [vmem:[%s161_s30] sm:$0xff]  ;;  %v197_v7 = vld [vmem:[%s170_s29] sm:$0xff]  ;;  %s195_s20 = scalar_lea.vmem [#allocation7], %s695_s6  ;;  %s342_s14 = sshll.u32 %s567_s13, 7 }
  0x50   : > { %v198_v1 = vand.u32 2147483647, %v196_v0  ;;  %v202_v9 = vmax.f32 %v196_v0, 0.0  ;;  %v203_v10 = vmul.f32 %v197_v7, %v196_v0  ;;  %s237_s7 = sshll.u32 %s195_s20, 4  ;;  %s235_s16 = scalar_lea.hbm %s747_s2, %s342_s14  ;;  %s238_s7 = int_to_ptr.vmem [resolvable:$true] %s237_s7 }
  0x51   : > { %s224_s17 = scalar_lea.sflag [#allocation4], %s692_s5  ;;  %s458_s24 = scalar_lea.vmem %s238_s7, 128 }
  0x52   : > { %v199_v2 = vsub.f32 0.0, %v198_v1  ;;  %v204_v14 = vsub.f32 %v202_v9, %v203_v10  ;;  %p459_p13 = scmp.ne.s32.totalorder %s238_s7, %s458_s24  ;;  %p760_p3 = scmp.ne.s32.totalorder %s752_s21, 0 }
  0x53   : > { %s530_s19 = smov [#allocation7]  }
  0x54   : > { %v200_v3 = vmul.f32 1.442695, %v199_v2  ;;  %p460_p7 = pnand %p459_p13, %p760_p3  ;;  %s462_s25 = sshll.u32 %s530_s19, 4  ;;  %s463_s25 = int_to_ptr.vmem [resolvable:$false] %s462_s25 }
  0x55   : > { %s464_s23 = scalar_lea.vmem %s463_s25, 256  ;;  %p465_p10 = scmp.lt.s32.totalorder %s238_s7, %s463_s25 }
  0x56   : > { %396 = vpow2.f32 %v200_v3  ;;  %p461_p8 = pneg %p460_p7  ;;  %p466_p2 = scmp.lt.s32.totalorder %s464_s23, %s458_s24 }
  0x58   : > { %p467_p4 = por %p466_p2, %p465_p10 }
  0x5a   : > { %p468_p5 = pnand %p467_p4, %p461_p8 }
  0x63   : > { %v397_v4 = vpop.eup %396 }
  0x64   : > { %v205_v5 = vadd.f32 1.0, %v397_v4  ;;  %v208_v6 = vmul.f32 -0.5, %v397_v4  ;;  %v211_v11 = vand.u32 2147483647, %v397_v4 }
  0x66   : > { %398 = vlog2.f32 %v205_v5  ;;  %v209_v8 = vadd.f32 1.0, %v208_v6  ;;  %vm212_vm0 = vcmp.lt.f32.partialorder %v211_v11, 0.0004427343 }
  0x68   : > { %v210_v12 = vmul.f32 %v397_v4, %v209_v8 }
  0x73   : > { %v399_v13 = vpop.eup %398 }
  0x74   : > { %v207_v15 = vmul.f32 0.6931472, %v399_v13 }
  0x76   : > { %v213_v16 = vsel %vm212_vm0, %v210_v12, %v207_v15 }
  0x77   : > { %v214_v17 = vadd.f32 %v213_v16, %v204_v14 }
  0x79   : > { %v215_v18 = vsub.f32 0.0, %v214_v17 }
  0x7b   : > { %v216_v19 = vmul.f32 1.442695, %v215_v18 }
  0x7d   : > { %400 = vpow2.f32 %v216_v19 }
  0x8a   : > { %v401_v20 = vpop.eup %400 }
  0x8b   : > { %v218_v21 = vsub.f32 1.0, %v401_v20 }
  0x8d   : > { %v219_v22 = vmul.f32 %v218_v21, %v218_v21 }
  0x8f   : > { %v220_v23 = vmul.f32 %v219_v22, %v214_v17 }
  0x91   : > { %222 = vst [vmem:[%s195_s20] sm:$0xff] %v220_v23 }
  0x92   : > { %471 = shalt.err (!%p468_p5)
}
  0x93   : > { %s472_s13 = scalar_lea.hbm %s235_s16, 128  ;;  %s476_s5 = scalar_lea.hbm %s747_s2, 256 }
  0x94   : > { %p473_p9 = scmp.ne.s32.totalorder %s235_s16, %s472_s13  ;;  %p477_p12 = scmp.lt.s32.totalorder %s235_s16, %s747_s2 }
  0x95   : > { %p478_p1 = scmp.lt.s32.totalorder %s476_s5, %s472_s13 }
  0x96   : > { %p474_p0 = pnand %p473_p9, %p760_p3 }
  0x97   : > { %p479_p6 = por %p478_p1, %p477_p12 }
  0x98   : > { %p475_p11 = pneg %p474_p0 }
  0x9a   : > { %p480_p13 = pnand %p479_p6, %p475_p11 }
  0x9c   : > { %483 = shalt.err (!%p480_p13)
}
  0x9d   : > { %349 = dma.vmem_to_hbm [thread:$0]  (%p760_p3), %s238_s7, 128, %s235_s16, %s224_s17  }
  0x9e PF: > { %s249_s30 = sand.u32 1, %s514_s9   ;;  %p761_p7 = scmp.ne.s32.totalorder %s753_s22, 0 }
  0x9f   : > { %p762_p8 = scmp.ge.s32.totalorder %s526_s12, 2  ;;  %s250_s3 = scalar_lea.sflag [#allocation4], %s249_s30 }
  0xa1   : > { %p359_p10 = pnand %p762_p8, %p761_p7 }
  0xa3   : > { %p360_p2 = pneg %p359_p10 }
  0xa5   : > { %509 = dma.done.wait (%p360_p2), %s250_s3, 128  }
  0xa6   : > { %511 = vsyncadd (%p360_p2), %s250_s3, 4294967168  ;;  %p18_p4 = scmp.ge.s32.totalorder %s571_s15, 4   ;;  %s763_s9 = smov %s518_s10 }
  0xa7   : > { %s764_s10 = smov %s522_s11  ;;  %s765_s11 = smov %s583_s18 }
  0xa8   : > { %s766_s12 = smov %s571_s15  ;;  %20 = sbr.rel (!%p18_p4) target bundleno = 7 (0x7), region = 86 }
  0xad   :  { %255 = vsyncpa [#allocation3], 1 }
  0xae   :  { %257 = vsyncpa [#allocation3 + $0x1], 1 }
  0xaf   :  { %258 = vsyncpa [#allocation6], 1 }
  0xb0   :  { %260 = vsyncpa [#allocation6 + $0x1], 1 }
  0xb1   :  { %261 = vsyncpa [#allocation4], 1 }
  0xb2   :  { %263 = vsyncpa [#allocation4 + $0x1], 1 }

</bundles_post_ra>
